<compile_context>
chip_gen: v7x
topology: tpu7x:2x2x1
jax: 0.10.0
libtpu: 0.0.40
codegen_flags: <defaults>
</compile_context>

<pallas_src>
import functools

import jax
import jax.numpy as jnp
from jax.experimental import pallas as pl
from jax.experimental.pallas import tpu as pltpu

_LANE = 128      # lane width of a vreg (last dim)
_SUBLANE = 8     # sublane width of a vreg (second-to-last dim)


def _round_up(n, m):
    return ((n + m - 1) // m) * m


def _mlp_kernel(*refs, n_layers, hidden_act, output_act, final_true_dim):
    """Fused MLP: chain all layers inside one kernel invocation.

    refs = (x_ref, w0_ref, b0_ref, ..., w{L-1}_ref, b{L-1}_ref,
            act0_ref, ..., act{L-1}_ref)
    All tensors are lane-padded to multiples of 128 (zeros in the padding).
    """
    out_refs = refs[1 + 2 * n_layers:]
    x = refs[0][...]                                   # (Bp, Dpad) f32
    for i in range(n_layers):
        w = refs[1 + 2 * i][...]                       # (Din_pad, Dout_pad)
        b = refs[2 + 2 * i][...]                       # (1, Dout_pad)
        # MXU: bf16 operands, f32 accumulation.  Zero-padded rows/cols of W
        # contribute exact zeros, so padding does not change the result.
        y = jnp.dot(x.astype(jnp.bfloat16), w.astype(jnp.bfloat16),
                    preferred_element_type=jnp.float32)
        y = y + b                                      # f32 bias add (VPU)

        act = hidden_act if i < n_layers - 1 else output_act
        if act == "tanh":
            x = jnp.tanh(y)
        elif act == "relu":
            x = jnp.maximum(y, 0.0)
        elif act == "sigmoid":
            x = jax.nn.sigmoid(y)
        elif act == "log_softmax":
            # Mask out lane padding so the softmax normalizes only over the
            # real `final_true_dim` logits.
            lane = jax.lax.broadcasted_iota(jnp.int32, y.shape, dimension=1)
            y = jnp.where(lane < final_true_dim, y, jnp.float32(-1e30))
            m = jnp.max(y, axis=-1, keepdims=True)
            z = y - m
            lse = jnp.log(jnp.sum(jnp.exp(z), axis=-1, keepdims=True))
            x = z - lse
        else:
            raise ValueError("Unknown activation")

        out_refs[i][...] = x.astype(out_refs[i].dtype)


class PallasNetwork:
    """JAX/Pallas re-implementation of the PyTorch `Network` MLP."""

    def __init__(self, input_dim, hidden_dims, output_dim,
                 hidden_activation="tanh", output_activation="sigmoid",
                 key=None):
        if hidden_activation not in ("tanh", "relu"):
            raise ValueError("Unknown activation")
        if output_activation not in ("sigmoid", "log_softmax"):
            raise ValueError("Unknown activation")
        self.input_dim = input_dim
        self.output_dim = output_dim
        self.n_hidden_layers = len(hidden_dims)
        self.hidden_activation = hidden_activation
        self.output_activation = output_activation

        if key is None:
            key = jax.random.PRNGKey(0)

        dims = [input_dim] + list(hidden_dims) + [output_dim]
        self.dims = dims
        self.params = []                      # unpadded (w:(in,out), b:(out,))
        for i in range(len(dims) - 1):
            prev_dim, dim = dims[i], dims[i + 1]
            key, wk, bk = jax.random.split(key, 3)
            # PyTorch nn.Linear default init: U(-1/sqrt(fan_in), 1/sqrt(fan_in))
            bound = 1.0 / (prev_dim ** 0.5)
            w = jax.random.uniform(wk, (prev_dim, dim), jnp.float32,
                                   minval=-bound, maxval=bound)
            b = jax.random.uniform(bk, (dim,), jnp.float32,
                                   minval=-bound, maxval=bound)
            self.params.append((w, b))

        # Lane-pad weights / biases once (zeros in padding), biases as (1, D).
        self._pdims = [_round_up(d, _LANE) for d in dims]
        self._flat_padded_params = []
        for i, (w, b) in enumerate(self.params):
            din_p, dout_p = self._pdims[i], self._pdims[i + 1]
            wp = jnp.zeros((din_p, dout_p), jnp.float32)
            wp = wp.at[:dims[i], :dims[i + 1]].set(w)
            bp = jnp.zeros((1, dout_p), jnp.float32)
            bp = bp.at[0, :dims[i + 1]].set(b)
            self._flat_padded_params += [wp, bp]

        self._jit_forward = jax.jit(self._forward_impl)

    def _forward_impl(self, x, *flat_params):
        n_layers = len(self.params)
        dims, pdims = self.dims, self._pdims
        batch = x.shape[0]
        bp = _round_up(batch, _SUBLANE)

        # Pad the input to (bp, pdims[0]) with zeros (lane/sublane dense).
        xp = jnp.zeros((bp, pdims[0]), jnp.float32)
        xp = xp.at[:batch, :dims[0]].set(x.astype(jnp.float32))

        kernel = functools.partial(
            _mlp_kernel,
            n_layers=n_layers,
            hidden_act=self.hidden_activation,
            output_act=self.output_activation,
            final_true_dim=dims[-1],
        )

        out_shape = tuple(
            jax.ShapeDtypeStruct((bp, pdims[i + 1]), jnp.float32)
            for i in range(n_layers)
        )
        n_in = 1 + 2 * n_layers

        flops = sum(2 * bp * pdims[i] * pdims[i + 1] for i in range(n_layers))
        transcendentals = sum(bp * pdims[i + 1] for i in range(n_layers))
        bytes_accessed = 4 * (
            bp * pdims[0]
            + sum(int(p.size) for p in flat_params)
            + sum(bp * pdims[i + 1] for i in range(n_layers))
        )

        outs = pl.pallas_call(
            kernel,
            out_shape=out_shape,
            # No grid: single invocation, every operand fully resident in VMEM
            # (no 1-step-grid bookkeeping or double-buffering).
            in_specs=[pl.BlockSpec(memory_space=pltpu.MemorySpace.VMEM)] * n_in,
            out_specs=tuple(
                pl.BlockSpec(memory_space=pltpu.MemorySpace.VMEM)
                for _ in range(n_layers)
            ),
            cost_estimate=pl.CostEstimate(
                flops=flops,
                transcendentals=transcendentals,
                bytes_accessed=bytes_accessed,
            ),
        )(xp, *flat_params)

        # Slice the padding off every per-layer activation.
        acts = [outs[i][:batch, :dims[i + 1]] for i in range(n_layers)]
        return acts[-1], acts

    def __call__(self, x):
        return self._jit_forward(x, *self._flat_padded_params)


def _reference_forward(net, x):
    """Pure-JAX reference (same bf16-operand / f32-accumulate matmul)."""
    acts = []
    h = x
    n = len(net.params)
    for i, (w, b) in enumerate(net.params):
        y = jnp.dot(h.astype(jnp.bfloat16), w.astype(jnp.bfloat16),
                    preferred_element_type=jnp.float32) + b
        act = net.hidden_activation if i < n - 1 else net.output_activation
        if act == "tanh":
            h = jnp.tanh(y)
        elif act == "relu":
            h = jnp.maximum(y, 0.0)
        elif act == "sigmoid":
            h = jax.nn.sigmoid(y)
        else:  # log_softmax over dim=1
            h = jax.nn.log_softmax(y, axis=1)
        acts.append(h)
    return h, acts


if __name__ == "__main__":
    key = jax.random.PRNGKey(0)
    key, xk, pk1, pk2 = jax.random.split(key, 4)

    batch = 8
    input_dim = 32
    hidden_dims = [64, 32]
    output_dim = 16

    x = jax.random.normal(xk, (batch, input_dim), jnp.float32)

    # --- tanh hidden / sigmoid output (default config) ---
    net = PallasNetwork(input_dim, hidden_dims, output_dim,
                        hidden_activation="tanh",
                        output_activation="sigmoid",
                        key=pk1)
    out, activations = net(x)
    out = jax.block_until_ready(out)
    activations = [jax.block_until_ready(a) for a in activations]

    ref_out, ref_acts = _reference_forward(net, x)
    assert out.shape == (batch, output_dim)
    assert len(activations) == len(hidden_dims) + 1
    assert jnp.allclose(out, ref_out, atol=1e-5, rtol=1e-4)
    for a, r in zip(activations, ref_acts):
        assert a.shape == r.shape
        assert jnp.allclose(a, r, atol=1e-5, rtol=1e-4)

    # --- relu hidden / log_softmax output (exercises the other branches) ---
    net2 = PallasNetwork(input_dim, hidden_dims, output_dim,
                         hidden_activation="relu",
                         output_activation="log_softmax",
                         key=pk2)
    out2, acts2 = net2(x)
    out2 = jax.block_until_ready(out2)
    ref_out2, ref_acts2 = _reference_forward(net2, x)
    assert jnp.allclose(out2, ref_out2, atol=1e-4, rtol=1e-4)
    for a, r in zip(acts2, ref_acts2):
        assert jnp.allclose(a, r, atol=1e-4, rtol=1e-4)
    # log_softmax rows must exponentiate to a probability distribution.
    assert jnp.allclose(jnp.sum(jnp.exp(out2), axis=1), 1.0, atol=1e-4)

    print("KERNEL_OK")
</pallas_src>

<mosaic_0001>
module attributes {stable_mosaic.version = 11 : i64} {
  func.func @_mlp_kernel(%arg0: memref<8x128xf32, #tpu.memory_space<vmem>>, %arg1: memref<128x128xf32, #tpu.memory_space<vmem>>, %arg2: memref<1x128xf32, #tpu.memory_space<vmem>>, %arg3: memref<128x128xf32, #tpu.memory_space<vmem>>, %arg4: memref<1x128xf32, #tpu.memory_space<vmem>>, %arg5: memref<128x128xf32, #tpu.memory_space<vmem>>, %arg6: memref<1x128xf32, #tpu.memory_space<vmem>>, %arg7: memref<8x128xf32, #tpu.memory_space<vmem>>, %arg8: memref<8x128xf32, #tpu.memory_space<vmem>>, %arg9: memref<8x128xf32, #tpu.memory_space<vmem>>) attributes {dimension_semantics = [], scalar_prefetch = 0 : i64, scratch_operands = 0 : i64, tpu.core_type = #tpu.core_type<tc>} {
    %c0 = arith.constant 0 : index
    %c0_0 = arith.constant 0 : index
    %0 = vector.load %arg0[%c0, %c0_0] : memref<8x128xf32, #tpu.memory_space<vmem>>, vector<8x128xf32>
    %c0_1 = arith.constant 0 : index
    %c0_2 = arith.constant 0 : index
    %1 = vector.load %arg1[%c0_1, %c0_2] : memref<128x128xf32, #tpu.memory_space<vmem>>, vector<128x128xf32>
    %c0_3 = arith.constant 0 : index
    %c0_4 = arith.constant 0 : index
    %2 = vector.load %arg2[%c0_3, %c0_4] : memref<1x128xf32, #tpu.memory_space<vmem>>, vector<1x128xf32>
    %3 = arith.truncf %0 : vector<8x128xf32> to vector<8x128xbf16>
    %4 = arith.truncf %1 : vector<128x128xf32> to vector<128x128xbf16>
    %cst = arith.constant dense<0.000000e+00> : vector<8x128xf32>
    %5 = tpu.matmul %3, %4, %cst {dimension_numbers = #tpu.dot_dimension_numbers<[1], [0], [0], [1], [0, 0, 1, 1], [], []>} : vector<8x128xbf16>, vector<128x128xbf16>, vector<8x128xf32> -> vector<8x128xf32>
    %6 = vector.broadcast %2 : vector<1x128xf32> to vector<8x128xf32>
    %7 = arith.addf %5, %6 : vector<8x128xf32>
    %8 = math.tanh %7 : vector<8x128xf32>
    %c0_5 = arith.constant 0 : index
    %c0_6 = arith.constant 0 : index
    %9 = vector.load %arg7[%c0_5, %c0_6] : memref<8x128xf32, #tpu.memory_space<vmem>>, vector<8x128xf32>
    tpu.vector_store %arg7[%c0_5, %c0_6], %8 {strides = array<i32>} : memref<8x128xf32, #tpu.memory_space<vmem>>, vector<8x128xf32>,
    %c0_7 = arith.constant 0 : index
    %c0_8 = arith.constant 0 : index
    %10 = vector.load %arg3[%c0_7, %c0_8] : memref<128x128xf32, #tpu.memory_space<vmem>>, vector<128x128xf32>
    %c0_9 = arith.constant 0 : index
    %c0_10 = arith.constant 0 : index
    %11 = vector.load %arg4[%c0_9, %c0_10] : memref<1x128xf32, #tpu.memory_space<vmem>>, vector<1x128xf32>
    %12 = arith.truncf %8 : vector<8x128xf32> to vector<8x128xbf16>
    %13 = arith.truncf %10 : vector<128x128xf32> to vector<128x128xbf16>
    %cst_11 = arith.constant dense<0.000000e+00> : vector<8x128xf32>
    %14 = tpu.matmul %12, %13, %cst_11 {dimension_numbers = #tpu.dot_dimension_numbers<[1], [0], [0], [1], [0, 0, 1, 1], [], []>} : vector<8x128xbf16>, vector<128x128xbf16>, vector<8x128xf32> -> vector<8x128xf32>
    %15 = vector.broadcast %11 : vector<1x128xf32> to vector<8x128xf32>
    %16 = arith.addf %14, %15 : vector<8x128xf32>
    %17 = math.tanh %16 : vector<8x128xf32>
    %c0_12 = arith.constant 0 : index
    %c0_13 = arith.constant 0 : index
    %18 = vector.load %arg8[%c0_12, %c0_13] : memref<8x128xf32, #tpu.memory_space<vmem>>, vector<8x128xf32>
    tpu.vector_store %arg8[%c0_12, %c0_13], %17 {strides = array<i32>} : memref<8x128xf32, #tpu.memory_space<vmem>>, vector<8x128xf32>,
    %c0_14 = arith.constant 0 : index
    %c0_15 = arith.constant 0 : index
    %19 = vector.load %arg5[%c0_14, %c0_15] : memref<128x128xf32, #tpu.memory_space<vmem>>, vector<128x128xf32>
    %c0_16 = arith.constant 0 : index
    %c0_17 = arith.constant 0 : index
    %20 = vector.load %arg6[%c0_16, %c0_17] : memref<1x128xf32, #tpu.memory_space<vmem>>, vector<1x128xf32>
    %21 = arith.truncf %17 : vector<8x128xf32> to vector<8x128xbf16>
    %22 = arith.truncf %19 : vector<128x128xf32> to vector<128x128xbf16>
    %cst_18 = arith.constant dense<0.000000e+00> : vector<8x128xf32>
    %23 = tpu.matmul %21, %22, %cst_18 {dimension_numbers = #tpu.dot_dimension_numbers<[1], [0], [0], [1], [0, 0, 1, 1], [], []>} : vector<8x128xbf16>, vector<128x128xbf16>, vector<8x128xf32> -> vector<8x128xf32>
    %24 = vector.broadcast %20 : vector<1x128xf32> to vector<8x128xf32>
    %25 = arith.addf %23, %24 : vector<8x128xf32>
    %26 = arith.negf %25 : vector<8x128xf32>
    %27 = math.exp %26 : vector<8x128xf32>
    %cst_19 = arith.constant 1.000000e+00 : f32
    %28 = vector.broadcast %cst_19 : f32 to vector<8x128xf32>
    %29 = arith.addf %28, %27 : vector<8x128xf32>
    %30 = arith.divf %28, %29 : vector<8x128xf32>
    %c0_20 = arith.constant 0 : index
    %c0_21 = arith.constant 0 : index
    %31 = vector.load %arg9[%c0_20, %c0_21] : memref<8x128xf32, #tpu.memory_space<vmem>>, vector<8x128xf32>
    tpu.vector_store %arg9[%c0_20, %c0_21], %30 {strides = array<i32>} : memref<8x128xf32, #tpu.memory_space<vmem>>, vector<8x128xf32>,
    return
  }
}

</mosaic_0001>

<bundles_post_ra>
// kernel: _forward_impl.1
= control target key start
LH: loop header
LB: loop body
LE: loop exit
PB: predicated region body
PF: predicated region fallthrough
CT: control target
= control target key end

     0   :  { %15 = vsyncpa [#allocation3], 0  ;;  %s741_s0 = inlined_call_operand.vmem [shape: f32[8,128], index: 0, kind: input, shape index: {}]   ;;  %s742_s1 = inlined_call_operand.hbm [shape: f32[128,128], index: 1, kind: input, shape index: {}]   ;;  %s743_s2 = inlined_call_operand.vmem [shape: f32[1,128], index: 2, kind: input, shape index: {}]   ;;  %s744_s3 = inlined_call_operand.hbm [shape: f32[128,128], index: 3, kind: input, shape index: {}]   ;;  %s745_s4 = inlined_call_operand.vmem [shape: f32[1,128], index: 4, kind: input, shape index: {}]   ;;  %s746_s5 = inlined_call_operand.hbm [shape: f32[128,128], index: 5, kind: input, shape index: {}]   ;;  %s747_s6 = inlined_call_operand.vmem [shape: f32[1,128], index: 6, kind: input, shape index: {}]   ;;  %s748_s7 = inlined_call_operand.hbm [shape: f32[8,128], index: 7, kind: output, shape index: {0}]   ;;  %s749_s8 = inlined_call_operand.hbm [shape: f32[8,128], index: 8, kind: output, shape index: {1}]   ;;  %s750_s9 = inlined_call_operand.vmem [shape: f32[8,128], index: 9, kind: output, shape index: {2}]  }
   0x1   :  { %16 = vsyncpa [#allocation6], 0 }
   0x2   :  { %17 = vsyncpa [#allocation4], 0 }
   0x3   :  { %18 = vsyncpa [#allocation10], 0  ;;  %s561_s30 = smov [#allocation5]   ;;  %s562_s11 = smov [#allocation2]  }
   0x4   :  { %s40_s10 = sshll.u32 %s561_s30, 4  ;;  %s26_s12 = sshll.u32 %s562_s11, 4  ;;  %s41_s10 = int_to_ptr.vmem [resolvable:$true] %s40_s10  ;;  %s620_s12 = int_to_ptr.vmem [resolvable:$true] %s26_s12 }
   0x5   :  { %s443_s15 = scalar_lea.hbm %s744_s3, 2048 }
   0x6   :  { %p444_p0 = scmp.ne.s32.totalorder %s744_s3, %s443_s15  ;;  %p447_p1 = scmp.lt.u32.totalorder %s443_s15, %s744_s3 }
   0x8   :  { %p449_p2 = pnand %p447_p1, %p444_p0 }
   0xa   :  { %452 = shalt.err (!%p449_p2)
}
   0xb   :  { %s453_s20 = scalar_lea.vmem %s41_s10, 2048  ;;  %p458_p4 = scmp.lt.s32.totalorder %s41_s10, %s41_s10 }
   0xc   :  { %p454_p3 = scmp.ne.s32.totalorder %s41_s10, %s453_s20  ;;  %p459_p5 = scmp.lt.s32.totalorder %s453_s20, %s453_s20 }
   0xe   :  { %p460_p6 = por %p459_p5, %p458_p4 }
  0x10   :  { %p461_p7 = pnand %p460_p6, %p454_p3 }
  0x12   :  { %464 = shalt.err (!%p461_p7)
}
  0x13   :  { %s563_s21 = smov 128   ;;  %s564_s22 = smov 8  }
  0x14   :  { %46 = dma.hbm_to_vmem [thread:$0]  %s744_s3, 2048, %s41_s10, [#allocation6], %s563_s21, %s563_s21, %s564_s22  }
  0x15   :  { %s465_s27 = scalar_lea.hbm %s742_s1, 2048 }
  0x16   :  { %p466_p8 = scmp.ne.s32.totalorder %s742_s1, %s465_s27  ;;  %p469_p9 = scmp.lt.u32.totalorder %s465_s27, %s742_s1 }
  0x18   :  { %p471_p10 = pnand %p469_p9, %p466_p8 }
  0x1a   :  { %474 = shalt.err (!%p471_p10)
}
  0x1b   :  { %s475_s13 = scalar_lea.vmem %s620_s12, 2048  ;;  %p480_p12 = scmp.lt.s32.totalorder %s620_s12, %s620_s12 }
  0x1c   :  { %p476_p11 = scmp.ne.s32.totalorder %s620_s12, %s475_s13  ;;  %p481_p13 = scmp.lt.s32.totalorder %s475_s13, %s475_s13 }
  0x1e   :  { %p482_p0 = por %p481_p13, %p480_p12 }
  0x20   :  { %p483_p1 = pnand %p482_p0, %p476_p11 }
  0x22   :  { %486 = shalt.err (!%p483_p1)
}
  0x23   :  { %32 = dma.hbm_to_vmem [thread:$0]  %s742_s1, 2048, %s620_s12, [#allocation3], %s563_s21, %s563_s21, %s564_s22  }
  0x24   :  { %s565_s14 = smov [#allocation7]   ;;  %s487_s18 = scalar_lea.hbm %s746_s5, 2048 }
  0x25   :  { %s54_s15 = sshll.u32 %s565_s14, 4  ;;  %p488_p2 = scmp.ne.s32.totalorder %s746_s5, %s487_s18  ;;  %s55_s15 = int_to_ptr.vmem [resolvable:$true] %s54_s15 }
  0x26   :  { %p491_p3 = scmp.lt.u32.totalorder %s487_s18, %s746_s5 }
  0x28   :  { %p493_p4 = pnand %p491_p3, %p488_p2 }
  0x2a   :  { %496 = shalt.err (!%p493_p4)
}
  0x2b   :  { %s497_s25 = scalar_lea.vmem %s55_s15, 2048  ;;  %p502_p6 = scmp.lt.s32.totalorder %s55_s15, %s55_s15 }
  0x2c   :  { %p498_p5 = scmp.ne.s32.totalorder %s55_s15, %s497_s25  ;;  %p503_p7 = scmp.lt.s32.totalorder %s497_s25, %s497_s25 }
  0x2e   :  { %p504_p8 = por %p503_p7, %p502_p6 }
  0x30   :  { %p505_p9 = pnand %p504_p8, %p498_p5 }
  0x32   :  { %508 = shalt.err (!%p505_p9)
}
  0x33   :  { %60 = dma.hbm_to_vmem [thread:$0]  %s746_s5, 2048, %s55_s15, [#allocation6], %s563_s21, %s563_s21, %s564_s22  }
  0x34   :  { %553 = dma.done.wait [#allocation3], 2048  }
  0x35   :  { %554 = vsyncadd [#allocation3], 4294965248 }
  0x36   :  { %555 = dma.done.wait [#allocation6], 4096  }
  0x37   :  { %556 = vsyncadd [#allocation6], 4294963200  ;;  %v566_v0 = vmov 0.0   ;;  %vm567_vm0 = vmmov 0   ;;  %v74_v1 = vld [vmem:[#allocation2] sm:$0xff]  ;;  %v75_v2 = vld [vmem:[#allocation2 + $0x8] sm:$0xff] }
  0x38   :  { %366 = vmatprep.subr.bf16.mxu0 %v566_v0  ;;  %382 = vmatprep.mubr.msk.bf16.mxu0 %vm567_vm0, %v566_v0  ;;  %v76_v3 = vld [vmem:[#allocation2 + $0x10] sm:$0xff]  ;;  %v92_v4 = vpack.c.bf16 %v75_v2, %v74_v1  ;;  %v77_v5 = vld [vmem:[#allocation2 + $0x18] sm:$0xff]  ;;  %v78_v7 = vld [vmem:[#allocation2 + $0x20] sm:$0xff]  ;;  %s568_s27 = smov [#allocation8]   ;;  %s569_s29 = smov [#allocation9]  }
  0x39   :  { %386 = vmatprep.subr.bf16.mxu1 %v566_v0  ;;  %402 = vmatprep.mubr.msk.bf16.mxu1 %vm567_vm0, %v566_v0  ;;  %v93_v6 = vpack.c.bf16 %v77_v5, %v76_v3  ;;  %v79_v8 = vld [vmem:[#allocation2 + $0x28] sm:$0xff]  ;;  %v148_v9 = vld [vmem:[#allocation5] sm:$0xff]  ;;  %v150_v11 = vld [vmem:[#allocation5 + $0x10] sm:$0xff]  ;;  %s307_s28 = sshll.u32 %s568_s27, 4  ;;  %s317_s30 = sshll.u32 %s569_s29, 4  ;;  %s308_s28 = int_to_ptr.vmem [resolvable:$true] %s307_s28  ;;  %s318_s30 = int_to_ptr.vmem [resolvable:$true] %s317_s30 }
  0x3a   :  { %367 = vmatpush3.bf16.msra.mxu0 %v92_v4  ;;  %v149_v10 = vld [vmem:[#allocation5 + $0x8] sm:$0xff]  ;;  %v151_v12 = vld [vmem:[#allocation5 + $0x18] sm:$0xff]  ;;  %v94_v13 = vpack.c.bf16 %v79_v8, %v78_v7  ;;  %v80_v15 = vld [vmem:[#allocation2 + $0x30] sm:$0xff]  ;;  %s509_s11 = scalar_lea.vmem %s308_s28, 128  ;;  %p514_p11 = scmp.lt.s32.totalorder %s308_s28, %s308_s28 }
  0x3b   :  { %368 = vmatprep.subr.bf16.mxu0 %v566_v0  ;;  %v166_v14 = vpack.c.bf16 %v149_v10, %v148_v9  ;;  %v81_v16 = vld [vmem:[#allocation2 + $0x38] sm:$0xff]  ;;  %v167_v17 = vpack.c.bf16 %v151_v12, %v150_v11  ;;  %v152_v18 = vld [vmem:[#allocation5 + $0x20] sm:$0xff]  ;;  %v153_v19 = vld [vmem:[#allocation5 + $0x28] sm:$0xff]  ;;  %p510_p10 = scmp.ne.s32.totalorder %s308_s28, %s509_s11  ;;  %p515_p12 = scmp.lt.s32.totalorder %s509_s11, %s509_s11 }
  0x3c   :  { %v95_v20 = vpack.c.bf16 %v81_v16, %v80_v15  ;;  %v82_v21 = vld [vmem:[#allocation2 + $0x40] sm:$0xff]  ;;  %v83_v22 = vld [vmem:[#allocation2 + $0x48] sm:$0xff]  ;;  %v168_v23 = vpack.c.bf16 %v153_v19, %v152_v18  ;;  %v154_v24 = vld [vmem:[#allocation5 + $0x30] sm:$0xff] }
  0x3d   :  { %387 = vmatpush3.bf16.msra.mxu1 %v166_v14  ;;  %v155_v25 = vld [vmem:[#allocation5 + $0x38] sm:$0xff]  ;;  %v96_v26 = vpack.c.bf16 %v83_v22, %v82_v21  ;;  %v84_v27 = vld [vmem:[#allocation2 + $0x50] sm:$0xff]  ;;  %v86_v31 = vld [vmem:[#allocation2 + $0x60] sm:$0xff]  ;;  %p516_p13 = por %p515_p12, %p514_p11 }
  0x3e   :  { %369 = vmatpush3.bf16.msra.mxu0 %v93_v6  ;;  %388 = vmatprep.subr.bf16.mxu1 %v566_v0  ;;  %v85_v28 = vld [vmem:[#allocation2 + $0x58] sm:$0xff]  ;;  %v169_v29 = vpack.c.bf16 %v155_v25, %v154_v24  ;;  %v87_v32 = vld [vmem:[#allocation2 + $0x68] sm:$0xff]  ;;  %v88_v34 = vld [vmem:[#allocation2 + $0x70] sm:$0xff] }
  0x3f   :  { %370 = vmatprep.subr.bf16.mxu0 %v566_v0  ;;  %v97_v30 = vpack.c.bf16 %v85_v28, %v84_v27  ;;  %v98_v33 = vpack.c.bf16 %v87_v32, %v86_v31  ;;  %v89_v35 = vld [vmem:[#allocation2 + $0x78] sm:$0xff]  ;;  %v73_v37 = vld [vmem:[%s741_s0] sm:$0xff]  ;;  %v157_v40 = vld [vmem:[#allocation5 + $0x48] sm:$0xff]  ;;  %p517_p0 = pnand %p516_p13, %p510_p10 }
  0x40   :  { %v99_v36 = vpack.c.bf16 %v89_v35, %v88_v34  ;;  %v91_v38 = vpack.c.bf16 %v73_v37, %v73_v37  ;;  %v156_v39 = vld [vmem:[#allocation5 + $0x40] sm:$0xff]  ;;  %v158_v42 = vld [vmem:[#allocation5 + $0x50] sm:$0xff]  ;;  %v159_v43 = vld [vmem:[#allocation5 + $0x58] sm:$0xff] }
  0x41   :  { %389 = vmatpush3.bf16.msra.mxu1 %v167_v17  ;;  %v170_v41 = vpack.c.bf16 %v157_v40, %v156_v39  ;;  %v171_v44 = vpack.c.bf16 %v159_v43, %v158_v42  ;;  %v160_v45 = vld [vmem:[#allocation5 + $0x60] sm:$0xff]  ;;  %v161_v46 = vld [vmem:[#allocation5 + $0x68] sm:$0xff]  ;;  %v162_v48 = vld [vmem:[#allocation5 + $0x70] sm:$0xff] }
  0x42   :  { %371 = vmatpush3.bf16.msra.mxu0 %v94_v13  ;;  %390 = vmatprep.subr.bf16.mxu1 %v566_v0  ;;  %v172_v47 = vpack.c.bf16 %v161_v46, %v160_v45  ;;  %v163_v49 = vld [vmem:[#allocation5 + $0x78] sm:$0xff]  ;;  %v222_v51 = vld [vmem:[#allocation7] sm:$0xff]  ;;  %v223_v52 = vld [vmem:[#allocation7 + $0x8] sm:$0xff] }
  0x43   :  { %372 = vmatprep.subr.bf16.mxu0 %v566_v0  ;;  %v173_v50 = vpack.c.bf16 %v163_v49, %v162_v48  ;;  %v224_v53 = vld [vmem:[#allocation7 + $0x10] sm:$0xff]  ;;  %v240_v54 = vpack.c.bf16 %v223_v52, %v222_v51  ;;  %v225_v55 = vld [vmem:[#allocation7 + $0x18] sm:$0xff]  ;;  %v226_v57 = vld [vmem:[#allocation7 + $0x20] sm:$0xff] }
  0x44   :  { %v241_v56 = vpack.c.bf16 %v225_v55, %v224_v53  ;;  %v227_v58 = vld [vmem:[#allocation7 + $0x28] sm:$0xff]  ;;  %v228_v60 = vld [vmem:[#allocation7 + $0x30] sm:$0xff]  ;;  %v229_v61 = vld [vmem:[#allocation7 + $0x38] sm:$0xff] }
  0x45   :  { %391 = vmatpush3.bf16.msra.mxu1 %v168_v23  ;;  %v242_v59 = vpack.c.bf16 %v227_v58, %v226_v57  ;;  %v243_v62 = vpack.c.bf16 %v229_v61, %v228_v60  ;;  %v335_v63 = vld [vmem:[%s743_s2] ss:$0 sm:$0xff]  ;;  %v231_v9 = vld [vmem:[#allocation7 + $0x48] sm:$0xff]  ;;  %v232_v11 = vld [vmem:[#allocation7 + $0x50] sm:$0xff] }
  0x46   :  { %373 = vmatpush3.bf16.msra.mxu0 %v95_v20  ;;  %392 = vmatprep.subr.bf16.mxu1 %v566_v0  ;;  %v230_v8 = vld [vmem:[#allocation7 + $0x40] sm:$0xff]  ;;  %v233_v12 = vld [vmem:[#allocation7 + $0x58] sm:$0xff]  ;;  %v235_v15 = vld [vmem:[#allocation7 + $0x68] sm:$0xff] }
  0x47   :  { %374 = vmatprep.subr.bf16.mxu0 %v566_v0  ;;  %v244_v10 = vpack.c.bf16 %v231_v9, %v230_v8  ;;  %v245_v13 = vpack.c.bf16 %v233_v12, %v232_v11  ;;  %v234_v14 = vld [vmem:[#allocation7 + $0x60] sm:$0xff]  ;;  %v236_v17 = vld [vmem:[#allocation7 + $0x70] sm:$0xff]  ;;  %v237_v18 = vld [vmem:[#allocation7 + $0x78] sm:$0xff] }
  0x48   :  { %v246_v16 = vpack.c.bf16 %v235_v15, %v234_v14  ;;  %v247_v19 = vpack.c.bf16 %v237_v18, %v236_v17  ;;  %v336_v20 = vld [vmem:[%s745_s4] ss:$0 sm:$0xff] }
  0x49   :  { %393 = vmatpush3.bf16.msra.mxu1 %v169_v29 }
  0x4a   :  { %375 = vmatpush3.bf16.msra.mxu0 %v96_v26  ;;  %394 = vmatprep.subr.bf16.mxu1 %v566_v0 }
  0x4b   :  { %376 = vmatprep.subr.bf16.mxu0 %v566_v0 }
  0x4d   :  { %395 = vmatpush3.bf16.msra.mxu1 %v170_v41 }
  0x4e   :  { %377 = vmatpush3.bf16.msra.mxu0 %v97_v30  ;;  %396 = vmatprep.subr.bf16.mxu1 %v566_v0 }
  0x4f   :  { %378 = vmatprep.subr.bf16.mxu0 %v566_v0 }
  0x51   :  { %397 = vmatpush3.bf16.msra.mxu1 %v171_v44 }
  0x52   :  { %379 = vmatpush3.bf16.msra.mxu0 %v98_v33  ;;  %398 = vmatprep.subr.bf16.mxu1 %v566_v0 }
  0x53   :  { %380 = vmatprep.subr.bf16.mxu0 %v566_v0 }
  0x55   :  { %399 = vmatpush3.bf16.msra.mxu1 %v172_v47 }
  0x56   :  { %381 = vmatpush3.bf16.msra.mxu0 %v99_v36  ;;  %400 = vmatprep.subr.bf16.mxu1 %v566_v0 }
  0x57   :  { %406 = vmatprep.subr.bf16.mxu0 %v566_v0 }
  0x59   :  { %383 = vmatmul.mubr.bf16.vlgmr.msra.gmra.mrb[0].mxu0 %v91_v38  ;;  %401 = vmatpush3.bf16.msra.mxu1 %v173_v50 }
  0x5a   :  { %422 = vmatprep.mubr.msk.bf16.mxu0 %vm567_vm0, %v566_v0  ;;  %407 = vmatpush3.bf16.msra.mxu0 %v240_v54 }
  0x5b   :  { %408 = vmatprep.subr.bf16.mxu0 %v566_v0 }
  0x5e   :  { %409 = vmatpush3.bf16.msra.mxu0 %v241_v56 }
  0x5f   :  { %410 = vmatprep.subr.bf16.mxu0 %v566_v0 }
  0x62   :  { %411 = vmatpush3.bf16.msra.mxu0 %v242_v59 }
  0x63   :  { %412 = vmatprep.subr.bf16.mxu0 %v566_v0 }
  0x66   :  { %413 = vmatpush3.bf16.msra.mxu0 %v243_v62 }
  0x67   :  { %414 = vmatprep.subr.bf16.mxu0 %v566_v0 }
  0x6a   :  { %415 = vmatpush3.bf16.msra.mxu0 %v244_v10 }
  0x6b   :  { %416 = vmatprep.subr.bf16.mxu0 %v566_v0 }
  0x6e   :  { %417 = vmatpush3.bf16.msra.mxu0 %v245_v13 }
  0x6f   :  { %418 = vmatprep.subr.bf16.mxu0 %v566_v0 }
  0x72   :  { %419 = vmatpush3.bf16.msra.mxu0 %v246_v16 }
  0x73   :  { %420 = vmatprep.subr.bf16.mxu0 %v566_v0 }
  0x76   :  { %421 = vmatpush3.bf16.msra.mxu0 %v247_v19 }
 0x12c   :  { %v140_v1 = vpop.f32.mrb[0].mxu0 }
 0x12d   :  { %v141_v2 = vadd.f32 %v335_v63, %v140_v1  ;;  %v384_v3 = vpop.f32.mrb[1].mxu0 }
 0x12e   :  { %v143_v4 = vpop.f32.mrb[2].mxu0 }
 0x12f   :  { %435 = vtanh.f32 %v141_v2  ;;  %v385_v5 = vpop.f32.mrb[3].mxu0 }
 0x139   :  { %v436_v6 = vpop.eup %435 }
 0x13a   :  { %147 = vst [vmem:[#allocation8] sm:$0xff] %v436_v6  ;;  %v165_v7 = vpack.c.bf16 %v436_v6, %v436_v6 }
 0x13c   :  { %403 = vmatmul.mubr.bf16.vlgmr.msra.gmra.mrb[0].mxu1 %v165_v7 }
 0x20f   :  { %v214_v21 = vpop.f32.mrb[0].mxu1 }
 0x210   :  { %v215_v22 = vadd.f32 %v336_v20, %v214_v21  ;;  %v404_v23 = vpop.f32.mrb[1].mxu1 }
 0x211   :  { %v217_v24 = vpop.f32.mrb[2].mxu1 }
 0x212   :  { %437 = vtanh.f32 %v215_v22  ;;  %v405_v25 = vpop.f32.mrb[3].mxu1 }
 0x21c   :  { %v438_v26 = vpop.eup %437 }
 0x21d   :  { %221 = vst [vmem:[#allocation9] sm:$0xff] %v438_v26  ;;  %v239_v27 = vpack.c.bf16 %v438_v26, %v438_v26 }
 0x21f   :  { %423 = vmatmul.mubr.bf16.vlgmr.msra.gmra.mrb[4].mxu0 %v239_v27 }
 0x220   :  { %520 = shalt.err (!%p517_p0)
}
 0x221   :  { %s521_s3 = scalar_lea.hbm %s748_s7, 128 }
 0x222   :  { %p522_p1 = scmp.ne.s32.totalorder %s748_s7, %s521_s3  ;;  %p525_p2 = scmp.lt.u32.totalorder %s521_s3, %s748_s7 }
 0x224   :  { %p527_p3 = pnand %p525_p2, %p522_p1 }
 0x226   :  { %530 = shalt.err (!%p527_p3)
}
 0x227   :  { %310 = dma.vmem_to_hbm [thread:$0]  %s308_s28, 128, %s748_s7, [#allocation4]  }
 0x228   :  { %s531_s19 = scalar_lea.vmem %s318_s30, 128  ;;  %p536_p5 = scmp.lt.s32.totalorder %s318_s30, %s318_s30 }
 0x229   :  { %p532_p4 = scmp.ne.s32.totalorder %s318_s30, %s531_s19  ;;  %p537_p6 = scmp.lt.s32.totalorder %s531_s19, %s531_s19 }
 0x22b   :  { %p538_p7 = por %p537_p6, %p536_p5 }
 0x22d   :  { %p539_p8 = pnand %p538_p7, %p532_p4 }
 0x22f   :  { %542 = shalt.err (!%p539_p8)
}
 0x230   :  { %s543_s24 = scalar_lea.hbm %s749_s8, 128 }
 0x231   :  { %p544_p9 = scmp.ne.s32.totalorder %s749_s8, %s543_s24  ;;  %p547_p10 = scmp.lt.u32.totalorder %s543_s24, %s749_s8 }
 0x233   :  { %p549_p11 = pnand %p547_p10, %p544_p9 }
 0x235   :  { %552 = shalt.err (!%p549_p11)
}
 0x236   :  { %320 = dma.vmem_to_hbm [thread:$0]  %s318_s30, 128, %s749_s8, [#allocation10]   ;;  %v337_v0 = vld [vmem:[%s747_s6] ss:$0 sm:$0xff] }
 0x2f2   :  { %v288_v28 = vpop.f32.mrb[4].mxu0 }
 0x2f3   :  { %v289_v29 = vadd.f32 %v337_v0, %v288_v28  ;;  %v424_v30 = vpop.f32.mrb[5].mxu0 }
 0x2f4   :  { %v291_v31 = vpop.f32.mrb[6].mxu0 }
 0x2f5   :  { %v338_v32 = vmul.f32 -1.442695, %v289_v29  ;;  %v425_v33 = vpop.f32.mrb[7].mxu0 }
 0x2f7   :  { %439 = vpow2.f32 %v338_v32 }
 0x301   :  { %v440_v34 = vpop.eup %439 }
 0x302   :  { %v297_v35 = vadd.f32 1.0, %v440_v34 }
 0x304   :  { %441 = vrcp.f32 %v297_v35 }
 0x30e   :  { %v442_v36 = vpop.eup %441 }
 0x30f   :  { %300 = vst [vmem:[%s750_s9] sm:$0xff] %v442_v36 }
 0x310   :  { %557 = dma.done.wait [#allocation4], 128  }
 0x311   :  { %558 = vsyncadd [#allocation4], 4294967168 }
 0x312   :  { %559 = dma.done.wait [#allocation10], 128  }
 0x313   :  { %560 = vsyncadd [#allocation10], 4294967168 }
 0x314   :  { %331 = vsyncpa [#allocation3], 1 }
 0x315   :  { %332 = vsyncpa [#allocation6], 1 }
 0x316   :  { %333 = vsyncpa [#allocation4], 1 }
 0x317   :  { %334 = vsyncpa [#allocation10], 1 }

</bundles_post_ra>
